<compile_context>
chip_gen: v5e
topology: v5e:2x2
jax: 0.10.0
libtpu: 0.0.40
codegen_flags: <defaults>
</compile_context>

<pallas_src>
import functools
import math

import jax
import jax.numpy as jnp
from jax.experimental import pallas as pl
from jax.experimental.pallas import tpu as pltpu


# ---------------------------------------------------------------------------
# Kernels
# ---------------------------------------------------------------------------

def _pe_add_kernel(x_ref, pe_ref, o_ref):
    # x_ref: (B, TILE), pe_ref: (1, TILE) broadcast over batch rows.
    o_ref[...] = x_ref[...] + pe_ref[...]


def _pe_add_dropout_kernel(x_ref, pe_ref, u_ref, o_ref, *, p, scale):
    # x_ref: (B, TILE), pe_ref: (1, TILE), u_ref: (B, TILE) uniform [0, 1).
    y = x_ref[...] + pe_ref[...]
    keep = u_ref[...] >= jnp.float32(p)
    o_ref[...] = jnp.where(keep, y * jnp.asarray(scale, y.dtype), jnp.zeros_like(y))


# ---------------------------------------------------------------------------
# Parameter setup (mirrors PyTorch __init__)
# ---------------------------------------------------------------------------

def make_pe_table(d_model, max_len=5000, dtype=jnp.float32):
    """Sinusoidal positional-encoding buffer, identical to the PyTorch __init__."""
    position = jnp.arange(0, max_len, dtype=jnp.float32)[:, None]              # (max_len, 1)
    div_term = jnp.exp(
        jnp.arange(0, d_model, 2, dtype=jnp.float32) * -(math.log(10000.0) / d_model)
    )                                                                           # (d_model/2,)
    pe = jnp.zeros((max_len, d_model), dtype=jnp.float32)
    pe = pe.at[:, 0::2].set(jnp.sin(position * div_term))
    pe = pe.at[:, 1::2].set(jnp.cos(position * div_term))
    return pe.astype(dtype)                                                     # (max_len, d_model)


# ---------------------------------------------------------------------------
# Wrapper
# ---------------------------------------------------------------------------

def _choose_tile(n, b, itemsize, max_block_bytes=1 << 20):
    """Largest multiple of 128 that divides n and keeps one (b, tile) block <= budget."""
    best = None
    t = 128
    while t <= n:
        if n % t == 0 and b * t * itemsize <= max_block_bytes:
            best = t
        t += 128
    return best if best is not None else n  # fall back to full last dim (always legal)


def positional_encoding_forward(x, pe_table, *, dropout_p=0.1, key=None, train=True):
    """x: (B, S, D). Returns dropout(x + pe[:S]) with inverted-dropout scaling."""
    B, S, D = x.shape
    N = S * D
    dtype = x.dtype

    # Hoisted out of the kernel: slice, cast to x.dtype, make lane-dense.
    pe = pe_table[:S].astype(dtype).reshape(1, N)
    x2 = x.reshape(B, N)

    p = float(dropout_p) if train else 0.0
    assert 0.0 <= p < 1.0, "dropout_p must be in [0, 1)"

    tile = _choose_tile(N, B, jnp.dtype(dtype).itemsize)
    grid = (N // tile,)

    x_spec = pl.BlockSpec((B, tile), lambda j: (0, j))
    pe_spec = pl.BlockSpec((1, tile), lambda j: (0, j))
    out_spec = pl.BlockSpec((B, tile), lambda j: (0, j))

    compiler_params = pltpu.CompilerParams(
        dimension_semantics=("parallel",),          # column tiles shard across TCs
        vmem_limit_bytes=32 * 1024 * 1024,          # explicit, with headroom on all gens
    )

    if p > 0.0:
        if key is None:
            key = jax.random.PRNGKey(0)
        u = jax.random.uniform(key, (B, N), dtype=jnp.float32)
        kernel = functools.partial(_pe_add_dropout_kernel, p=p, scale=1.0 / (1.0 - p))
        out = pl.pallas_call(
            kernel,
            out_shape=jax.ShapeDtypeStruct((B, N), dtype),
            grid=grid,
            in_specs=[x_spec, pe_spec, pl.BlockSpec((B, tile), lambda j: (0, j))],
            out_specs=out_spec,
            compiler_params=compiler_params,
        )(x2, pe, u)
    else:
        out = pl.pallas_call(
            _pe_add_kernel,
            out_shape=jax.ShapeDtypeStruct((B, N), dtype),
            grid=grid,
            in_specs=[x_spec, pe_spec],
            out_specs=out_spec,
            compiler_params=compiler_params,
        )(x2, pe)

    return out.reshape(B, S, D)


# ---------------------------------------------------------------------------
# Demo / correctness check
# ---------------------------------------------------------------------------

if __name__ == "__main__":
    B, S, D = 2, 8, 32          # batch=2, seq=8, d_model=32
    max_len = 64                # small synthetic max_len (module default is 5000)
    dropout_p = 0.1

    key = jax.random.PRNGKey(0)
    kx, kd = jax.random.split(key)
    x = jax.random.normal(kx, (B, S, D), dtype=jnp.float32)

    pe_table = make_pe_table(D, max_len=max_len)
    ref = x + pe_table[None, :S, :]

    # 1) eval-mode (dropout identity): exact semantics x + pe[:S]
    y_eval = positional_encoding_forward(x, pe_table, dropout_p=dropout_p, train=False)
    y_eval = jax.block_until_ready(y_eval)
    assert jnp.allclose(y_eval, ref, atol=1e-6, rtol=1e-6), "eval-mode mismatch"

    # 2) train-mode (inverted dropout): every element is either 0 or (x+pe)/(1-p)
    y_train = positional_encoding_forward(
        x, pe_table, dropout_p=dropout_p, key=kd, train=True
    )
    y_train = jax.block_until_ready(y_train)
    assert y_train.shape == (B, S, D)
    scaled_ref = ref / (1.0 - dropout_p)
    kept = y_train != 0
    assert jnp.allclose(
        jnp.where(kept, y_train, scaled_ref), scaled_ref, atol=1e-5, rtol=1e-5
    ), "train-mode values are not 0 or scaled (x + pe)"
    # TODO(synk): the dropout mask uses JAX's RNG, not torch's RNG stream, so it
    # will not bit-match nn.Dropout; keep-probability and scaling semantics match.

    print("KERNEL_OK")
</pallas_src>

<mosaic_0001>
module attributes {stable_mosaic.version = 11 : i64} {
  func.func @_pe_add_kernel(%arg0: i32, %arg1: memref<2x256xf32, #tpu.memory_space<vmem>>, %arg2: memref<1x256xf32, #tpu.memory_space<vmem>>, %arg3: memref<2x256xf32, #tpu.memory_space<vmem>>) attributes {dimension_semantics = [#tpu.dimension_semantics<parallel>], iteration_bounds = array<i64: 1>, scalar_prefetch = 0 : i64, scratch_operands = 0 : i64, tpu.core_type = #tpu.core_type<tc>, window_params = [{transform_indices = @transform_0, window_bounds = array<i64: 2, 256>}, {transform_indices = @transform_1, window_bounds = array<i64: 1, 256>}, {transform_indices = @transform_2, window_bounds = array<i64: 2, 256>}]} {
    %c0 = arith.constant 0 : index
    %c0_0 = arith.constant 0 : index
    %0 = vector.load %arg1[%c0, %c0_0] : memref<2x256xf32, #tpu.memory_space<vmem>>, vector<2x256xf32>
    %c0_1 = arith.constant 0 : index
    %c0_2 = arith.constant 0 : index
    %1 = vector.load %arg2[%c0_1, %c0_2] : memref<1x256xf32, #tpu.memory_space<vmem>>, vector<1x256xf32>
    %2 = vector.broadcast %1 : vector<1x256xf32> to vector<2x256xf32>
    %3 = arith.addf %0, %2 : vector<2x256xf32>
    %c0_3 = arith.constant 0 : index
    %c0_4 = arith.constant 0 : index
    %4 = vector.load %arg3[%c0_3, %c0_4] : memref<2x256xf32, #tpu.memory_space<vmem>>, vector<2x256xf32>
    tpu.vector_store %arg3[%c0_3, %c0_4], %3 {strides = array<i32>} : memref<2x256xf32, #tpu.memory_space<vmem>>, vector<2x256xf32>,
    return
  }
  func.func @transform_0(%arg0: i32) -> (i32, i32) {
    %c0_i32 = arith.constant 0 : i32
    %c0_i32_0 = arith.constant 0 : i32
    return %c0_i32, %arg0 : i32, i32
  }
  func.func @transform_1(%arg0: i32) -> (i32, i32) {
    %c0_i32 = arith.constant 0 : i32
    %c0_i32_0 = arith.constant 0 : i32
    return %c0_i32, %arg0 : i32, i32
  }
  func.func @transform_2(%arg0: i32) -> (i32, i32) {
    %c0_i32 = arith.constant 0 : i32
    %c0_i32_0 = arith.constant 0 : i32
    return %c0_i32, %arg0 : i32, i32
  }
}

</mosaic_0001>

<bundles_post_ra>
// kernel: tpu_custom_call.1
= control target key start
LH: loop header
LB: loop body
LE: loop exit
PB: predicated region body
PF: predicated region fallthrough
CT: control target
= control target key end

     0   :  { %7 = vsyncpa [#allocation3], 0  ;;  %s177_s0 = inlined_call_operand.hbm [shape: f32[2,256], index: 0, kind: input, shape index: {}]   ;;  %s178_s1 = inlined_call_operand.hbm [shape: f32[1,256], index: 1, kind: input, shape index: {}]   ;;  %s179_s2 = inlined_call_operand.hbm [shape: f32[2,256], index: 2, kind: output, shape index: {}]  }
   0x1   :  { %8 = vsyncpa [#allocation6], 0 }
   0x2   :  { %9 = vsyncpa [#allocation4], 0  ;;  %s15_s11 = sshll.u32 %s177_s0, 4  ;;  %s150_s12 = smov [#allocation2]   ;;  %s16_s11 = int_to_ptr.hbm [resolvable:$true] %s15_s11 }
   0x3   :  { %s17_s13 = sshll.u32 %s150_s12, 4  ;;  %s26_s16 = sshll.u32 %s178_s1, 4  ;;  %s18_s13 = int_to_ptr.vmem [resolvable:$true] %s17_s13  ;;  %s27_s16 = int_to_ptr.hbm [resolvable:$true] %s26_s16 }
   0x4   :  { %20 = dma.hbm_to_vmem [thread:$0]  %s16_s11, 64, %s18_s13, [#allocation3]  }
   0x5   :  { %s151_s17 = smov [#allocation5]  }
   0x6   :  { %s28_s18 = sshll.u32 %s151_s17, 4  ;;  %s29_s18 = int_to_ptr.vmem [resolvable:$true] %s28_s18 }
   0x7   :  { %31 = dma.hbm_to_vmem [thread:$0]  %s27_s16, 32, %s29_s18, [#allocation6]  }
   0x8   :  { %144 = dma.done.wait [#allocation3], 64  }
   0x9   :  { %145 = vsyncadd [#allocation3], 4294967232 }
   0xa   :  { %146 = dma.done.wait [#allocation6], 32  }
   0xb   :  { %147 = vsyncadd [#allocation6], 4294967264  ;;  %v41_v0 = vld [vmem:[#allocation5] sm:$0x3]  ;;  %vm46_vm0 = vcmask 1041408   ;;  %s152_s0 = smov [#allocation7]  }
   0xc   :  { %v43_v1 = vperm.slane %v41_v0, 0  ;;  %v44_v2 = vperm.slane %v41_v0, 1  ;;  %v40_v3 = vld [vmem:[#allocation2] sm:$0xf]  ;;  %s56_s19 = sshll.u32 %s152_s0, 4  ;;  %s58_s21 = sshll.u32 %s179_s2, 4  ;;  %s57_s19 = int_to_ptr.vmem [resolvable:$true] %s56_s19  ;;  %s59_s21 = int_to_ptr.hbm [resolvable:$true] %s58_s21 }
   0xe   :  { %v45_v4 = vrot.slane %v44_v2, 6 }
  0x10   :  { %v47_v5 = vsel %vm46_vm0, %v43_v1, %v45_v4 }
  0x11   :  { %v49_v6 = vadd.f32 %v47_v5, %v40_v3 }
  0x13   :  { %50 = vst [vmem:[#allocation7] sm:$0xf] %v49_v6 }
  0x14   :  { %61 = dma.vmem_to_hbm [thread:$0]  %s57_s19, 64, %s59_s21, [#allocation4]  }
  0x15   :  { %148 = dma.done.wait [#allocation4], 64  }
  0x16   :  { %149 = vsyncadd [#allocation4], 4294967232 }
  0x17   :  { %66 = vsyncpa [#allocation3], 1 }
  0x18   :  { %67 = vsyncpa [#allocation6], 1 }
  0x19   :  { %68 = vsyncpa [#allocation4], 1 }

</bundles_post_ra>
